<compile_context>
chip_gen: v7x
topology: tpu7x:2x2x1
jax: 0.10.0
libtpu: 0.0.40
codegen_flags: <defaults>
</compile_context>

<pallas_src>
import functools

import jax
import jax.numpy as jnp
import numpy as np
from jax.experimental import pallas as pl
from jax.experimental.pallas import tpu as pltpu

ALPHA_SPATIAL = 0.12
ALPHA_PRESERVATION = 0.18
ALPHA_PHYSICS = 0.06
ALPHA_CORRELATION = 0.1


def _round_up(x, m):
    return ((x + m - 1) // m) * m


# --------------------------- Pallas streaming kernel ---------------------------
def _moment_kernel(pred_ref, targ_ref, out_ref,
                   sd2_ref, sp_ref, st_ref, spt_ref, sp2_ref, st2_ref,
                   *, S, T, tile_t, tiles_per_chunk, total_tiles,
                   needs_mask, has_pad):
    c = pl.program_id(0)              # time-chunk (parallel / megacore axis)
    k = pl.program_id(1)              # time tile within the chunk (arbitrary)
    gk = c * tiles_per_chunk + k      # global time-tile index
    last_gk = total_tiles - 1

    # ---- init per-chunk accumulators on the chunk's first tile ----
    @pl.when(k == 0)
    def _init():
        for r in (sd2_ref, sp_ref, st_ref, spt_ref, sp2_ref, st2_ref):
            r[...] = jnp.zeros_like(r)

    # ---- streaming accumulation of per-station raw moments ----
    def _accumulate(mask_tail):
        p = pred_ref[...].astype(jnp.float32)
        t = targ_ref[...].astype(jnp.float32)
        if mask_tail:
            # Only the final (partial) time tile pays for the mask.
            col = jax.lax.broadcasted_iota(jnp.int32, p.shape, 1) + gk * tile_t
            valid = col < T
            p = jnp.where(valid, p, 0.0)
            t = jnp.where(valid, t, 0.0)
        d = p - t
        sd2_ref[...] += jnp.sum(d * d, axis=1, keepdims=True)
        sp_ref[...] += jnp.sum(p, axis=1, keepdims=True)
        st_ref[...] += jnp.sum(t, axis=1, keepdims=True)
        spt_ref[...] += jnp.sum(p * t, axis=1, keepdims=True)
        sp2_ref[...] += jnp.sum(p * p, axis=1, keepdims=True)
        st2_ref[...] += jnp.sum(t * t, axis=1, keepdims=True)

    if needs_mask:
        @pl.when(gk < last_gk)
        def _full_tiles():
            _accumulate(False)

        @pl.when(gk == last_gk)
        def _tail_tile():
            _accumulate(True)
    elif has_pad:
        @pl.when(gk <= last_gk)
        def _valid_tiles():
            _accumulate(False)
    else:
        _accumulate(False)

    # ---- per-chunk finalize: pack the 6 moments into lanes 0..5 ----
    @pl.when(k == pl.num_programs(1) - 1)
    def _finalize():
        lane = jax.lax.broadcasted_iota(jnp.int32, (S, 128), 1)
        packed = (jnp.where(lane == 0, sd2_ref[...], 0.0)
                  + jnp.where(lane == 1, sp_ref[...], 0.0)
                  + jnp.where(lane == 2, st_ref[...], 0.0)
                  + jnp.where(lane == 3, spt_ref[...], 0.0)
                  + jnp.where(lane == 4, sp2_ref[...], 0.0)
                  + jnp.where(lane == 5, st2_ref[...], 0.0))
        out_ref[0] = packed


def _pick_tile_t(S, T, itemsize, vmem_budget_bytes):
    """tile_t as a multiple of 128 from a VMEM byte budget (review item #1/#2)."""
    t_pad = _round_up(T, 128)
    per_station_row = _round_up(S, 8) * 128 * 4          # one (S,1)/(S,128) f32 buffer
    fixed = 6 * per_station_row + 2 * per_station_row     # scratch + double-buffered out
    avail = max(vmem_budget_bytes - fixed, 0)
    # Per 128 lanes of time: 2 inputs x 2 pipeline buffers (input dtype) plus a
    # generous ~8 whole-block f32 elementwise temporaries inside the body.
    per_group = S * 128 * (4 * itemsize + 8 * 4)
    groups = max(avail // per_group, 1)
    return int(max(128, min(groups * 128, t_pad)))


def _streamed_moments(predicted, target, *, tile_t=None, num_time_chunks=2,
                      vmem_budget_bytes=20 * 1024 * 1024):
    """Pallas kernel: per-station raw moments of (predicted, target) over time."""
    S, T = predicted.shape
    itemsize = jnp.dtype(predicted.dtype).itemsize

    if tile_t is None:
        tile_t = _pick_tile_t(S, T, itemsize, vmem_budget_bytes)
    else:
        tile_t = max(128, min(_round_up(int(tile_t), 128), _round_up(T, 128)))

    total_tiles = (T + tile_t - 1) // tile_t
    n_chunks = max(1, min(int(num_time_chunks), total_tiles))
    tiles_per_chunk = (total_tiles + n_chunks - 1) // n_chunks
    has_pad = n_chunks * tiles_per_chunk > total_tiles
    needs_mask = (T % tile_t) != 0

    kernel = functools.partial(
        _moment_kernel, S=S, T=T, tile_t=tile_t,
        tiles_per_chunk=tiles_per_chunk, total_tiles=total_tiles,
        needs_mask=needs_mask, has_pad=has_pad)

    def time_map(c, k):
        # Clamp so the (at most one) padding grid step still issues an
        # in-bounds DMA; its accumulation is skipped by pl.when in the kernel.
        return (0, jnp.minimum(c * tiles_per_chunk + k, total_tiles - 1))

    big_spec = pl.BlockSpec((S, tile_t), time_map)

    cost = pl.CostEstimate(flops=10 * S * T, transcendentals=0,
                           bytes_accessed=2 * S * T * itemsize
                           + n_chunks * S * 128 * 4)

    moments = pl.pallas_call(
        kernel,
        out_shape=jax.ShapeDtypeStruct((n_chunks, S, 128), jnp.float32),
        grid=(n_chunks, tiles_per_chunk),
        in_specs=[big_spec, big_spec],
        out_specs=pl.BlockSpec((1, S, 128), lambda c, k: (c, 0, 0)),
        scratch_shapes=[pltpu.VMEM((S, 1), jnp.float32)] * 6,
        compiler_params=pltpu.CompilerParams(
            dimension_semantics=("parallel", "arbitrary"),
            vmem_limit_bytes=32 * 1024 * 1024),
        cost_estimate=cost,
    )(predicted, target)

    return jnp.sum(moments, axis=0)     # (S, 128), lanes 0..5 hold the moments


# --------------------------- full loss (kernel + tiny JAX finalize) -------------
def emd_hybrid_loss_pallas(predicted, target, emd_spatial_weights,
                           residual_amplitudes, residual_periods,
                           neighbor_indices, neighbor_weights, *,
                           tile_t=None, num_time_chunks=2,
                           vmem_budget_bytes=20 * 1024 * 1024):
    """Matches OptimizedEMDHybridLoss.forward -> (total_loss, components)."""
    S, T = predicted.shape

    m = _streamed_moments(predicted, target, tile_t=tile_t,
                          num_time_chunks=num_time_chunks,
                          vmem_budget_bytes=vmem_budget_bytes)
    sd2, sp, st_, spt, sp2, st2 = (m[:, i] for i in range(6))

    # ---- primary MSE ----
    primary = jnp.sum(sd2) / (S * T)

    # ---- correlation enhancement loss (from raw moments) ----
    inv_t = jnp.float32(1.0 / T)
    num = spt - sp * st_ * inv_t
    vp = jnp.maximum(sp2 - sp * sp * inv_t, 0.0)
    vt = jnp.maximum(st2 - st_ * st_ * inv_t, 0.0)
    den = jnp.sqrt(vp * vt)
    safe = den > 1e-8
    corr = num / jnp.where(safe, den, 1.0)
    per_station = jnp.where(
        safe, jnp.where(corr < 0.5, (1.0 - corr) ** 2, 1.0 - corr), 1.0)
    mean_cl = jnp.mean(per_station)
    var_cl = jnp.sum((per_station - mean_cl) ** 2) / max(S - 1, 1)   # torch.var
    correlation_loss = mean_cl + 0.2 * var_cl

    # ---- tiny O(S*5) regularizers (plain JAX per perf review) ----
    amps = residual_amplitudes.astype(jnp.float32)
    periods = residual_periods.astype(jnp.float32)
    esw = emd_spatial_weights.astype(jnp.float32)
    w = neighbor_weights.astype(jnp.float32)

    # consistency (model.optimized_consistency_loss)
    nb_amps = amps[neighbor_indices]                       # (S, K, 5)
    wm = jnp.einsum('skc,sk->sc', nb_amps, w)
    emd_pres = jnp.mean(jnp.maximum(jnp.abs(esw) - 0.25, 0.0))
    spatial_consistency = jnp.sum((amps - wm) ** 2)
    pdiff = jnp.abs(periods[1:] - periods[:-1])
    period_smoothness = jnp.sum(jnp.maximum(25.0 - pdiff, 0.0))
    consistency = emd_pres + spatial_consistency / (S * 5) + 0.1 * period_smoothness

    # enhanced preservation
    smp = jnp.mean(jnp.maximum(jnp.abs(esw) - 0.3, 0.0))
    energy = jnp.sum(amps ** 2, axis=1)
    residual_penalty = jnp.mean(jnp.maximum(energy - 150.0, 0.0))
    pd_pair = jnp.abs(periods[:, None] - periods[None, :])
    upper = jnp.triu(jnp.ones((5, 5), dtype=bool), k=1)
    period_diversity = jnp.sum(jnp.where(upper, jnp.maximum(20.0 - pd_pair, 0.0), 0.0))
    preservation = smp + 0.1 * residual_penalty + 0.05 * period_diversity

    # advanced physics regularization
    a_prev, a_next = amps[:, :4], amps[:, 1:]
    amp_prog = jnp.sum(jnp.maximum(jnp.abs(a_next - a_prev) - 10.0, 0.0)) / S
    period_pen = jnp.mean(jnp.maximum(jnp.sum(amps, axis=1) - 40.0, 0.0))
    incr = periods[:-1] < periods[1:]
    hd = a_prev - a_next * 1.5
    hierarchy = jnp.sum(jnp.where(incr[None, :] & (hd > 0.0), hd * hd, 0.0)) / S
    physics = amp_prog + period_pen + 0.1 * hierarchy

    total = (primary
             + ALPHA_SPATIAL * consistency
             + ALPHA_PRESERVATION * preservation
             + ALPHA_PHYSICS * physics
             + ALPHA_CORRELATION * correlation_loss)

    components = {
        'primary': primary,
        'spatial': consistency,
        'preservation': preservation,
        'physics': physics,
        'correlation': correlation_loss,
    }
    return total, components


# --------------------- pure-JAX reference for verification ---------------------
def _reference_loss(pred, targ, esw, amps, periods, indices, weights):
    S, T = pred.shape
    primary = jnp.mean((pred - targ) ** 2)

    emd_pres = jnp.mean(jnp.maximum(jnp.abs(esw) - 0.25, 0.0))
    nb_amps = amps[indices]
    wm = jnp.einsum('skc,sk->sc', nb_amps, weights)
    spatial = jnp.sum((amps - wm) ** 2)
    pdiff = jnp.abs(periods[1:] - periods[:-1])
    period_smooth = jnp.sum(jnp.maximum(25.0 - pdiff, 0.0))
    consistency = emd_pres + spatial / (S * 5) + 0.1 * period_smooth

    smp = jnp.mean(jnp.maximum(jnp.abs(esw) - 0.3, 0.0))
    energy = jnp.sum(amps ** 2, axis=1)
    rp = jnp.mean(jnp.maximum(energy - 150.0, 0.0))
    pd = 0.0
    for i in range(5):
        for j in range(i + 1, 5):
            pd += jnp.maximum(20.0 - jnp.abs(periods[i] - periods[j]), 0.0)
    preservation = smp + 0.1 * rp + 0.05 * pd

    aprev, anext = amps[:, :4], amps[:, 1:]
    amp_prog = jnp.sum(jnp.maximum(jnp.abs(anext - aprev) - 10.0, 0.0)) / S
    pp = jnp.mean(jnp.maximum(jnp.sum(amps, axis=1) - 40.0, 0.0))
    incr = periods[:-1] < periods[1:]
    hd = aprev - anext * 1.5
    hier = jnp.sum(jnp.where(incr[None, :] & (hd > 0), hd ** 2, 0.0)) / S
    physics = amp_prog + pp + 0.1 * hier

    pc = pred - pred.mean(axis=1, keepdims=True)
    tc = targ - targ.mean(axis=1, keepdims=True)
    num = jnp.sum(pc * tc, axis=1)
    den = jnp.sqrt(jnp.sum(pc ** 2, axis=1) * jnp.sum(tc ** 2, axis=1))
    corr = num / jnp.where(den > 1e-8, den, 1.0)
    per = jnp.where(den > 1e-8,
                    jnp.where(corr < 0.5, (1 - corr) ** 2, 1 - corr), 1.0)
    mean_cl = jnp.mean(per)
    var_cl = jnp.sum((per - mean_cl) ** 2) / max(S - 1, 1)
    corr_loss = mean_cl + 0.2 * var_cl

    total = (primary + ALPHA_SPATIAL * consistency + ALPHA_PRESERVATION * preservation
             + ALPHA_PHYSICS * physics + ALPHA_CORRELATION * corr_loss)
    return total


def _make_inputs(key, S, T, K):
    kp, kn, ka, ke, kw = jax.random.split(key, 5)
    predicted = jax.random.normal(kp, (S, T), dtype=jnp.float32) * 5.0
    target = predicted * 0.8 + jax.random.normal(kn, (S, T), dtype=jnp.float32) * 2.0
    amps = jax.random.uniform(ka, (S, 5), minval=0.0, maxval=9.0, dtype=jnp.float32)
    periods = jnp.array([25.0, 45.0, 75.0, 150.0, 300.0], dtype=jnp.float32)
    esw = jax.random.normal(ke, (S,), dtype=jnp.float32) * 0.4 + 0.1
    idx = (jnp.arange(S)[:, None] + jnp.arange(1, K + 1)[None, :]) % S
    raw_w = jax.random.uniform(kw, (S, K), minval=0.5, maxval=1.5, dtype=jnp.float32)
    w = raw_w / jnp.sum(raw_w, axis=1, keepdims=True)
    return predicted, target, esw, amps, periods, idx, w


if __name__ == "__main__":
    key = jax.random.PRNGKey(0)

    # case 1: forced small tile -> multi-tile streaming + masked tail + 2-chunk
    #         parallel split (with one padding grid step).
    # case 2: auto tile from VMEM budget (single full tile at this tiny size).
    # case 3: T not a multiple of 128 -> single partial (masked) tile.
    cases = [
        dict(S=8, T=640, K=4, tile_t=256),
        dict(S=8, T=640, K=4, tile_t=None),
        dict(S=16, T=215, K=4, tile_t=None),
    ]
    for i, cfg in enumerate(cases):
        sub = jax.random.fold_in(key, i)
        pred, targ, esw, amps, periods, idx, w = _make_inputs(
            sub, cfg['S'], cfg['T'], cfg['K'])
        total, comps = emd_hybrid_loss_pallas(
            pred, targ, esw, amps, periods, idx, w, tile_t=cfg['tile_t'])
        total = jax.block_until_ready(total)
        ref_total = _reference_loss(pred, targ, esw, amps, periods, idx, w)
        np.testing.assert_allclose(np.asarray(total), np.asarray(ref_total),
                                   rtol=1e-4, atol=1e-4)
        np.testing.assert_allclose(np.asarray(comps['primary']),
                                   np.asarray(jnp.mean((pred - targ) ** 2)),
                                   rtol=1e-4, atol=1e-4)

    # bf16 streaming path (halves HBM bytes of the dominant phase); reference is
    # computed on the same bf16-rounded inputs up-cast to f32.
    pred, targ, esw, amps, periods, idx, w = _make_inputs(
        jax.random.fold_in(key, 100), 8, 640, 4)
    pb, tb = pred.astype(jnp.bfloat16), targ.astype(jnp.bfloat16)
    total_bf16, _ = emd_hybrid_loss_pallas(pb, tb, esw, amps, periods, idx, w,
                                           tile_t=256)
    total_bf16 = jax.block_until_ready(total_bf16)
    ref_bf16 = _reference_loss(pb.astype(jnp.float32), tb.astype(jnp.float32),
                               esw, amps, periods, idx, w)
    np.testing.assert_allclose(np.asarray(total_bf16), np.asarray(ref_bf16),
                               rtol=1e-3, atol=1e-3)

    print("KERNEL_OK")
</pallas_src>

<mosaic_0001>
module attributes {stable_mosaic.version = 11 : i64} {
  func.func @_moment_kernel(%arg0: i32, %arg1: i32, %arg2: memref<8x256xf32, #tpu.memory_space<vmem>>, %arg3: memref<8x256xf32, #tpu.memory_space<vmem>>, %arg4: memref<1x8x128xf32, #tpu.memory_space<vmem>>, %arg5: memref<8x1xf32, #tpu.memory_space<vmem>>, %arg6: memref<8x1xf32, #tpu.memory_space<vmem>>, %arg7: memref<8x1xf32, #tpu.memory_space<vmem>>, %arg8: memref<8x1xf32, #tpu.memory_space<vmem>>, %arg9: memref<8x1xf32, #tpu.memory_space<vmem>>, %arg10: memref<8x1xf32, #tpu.memory_space<vmem>>) attributes {dimension_semantics = [#tpu.dimension_semantics<parallel>, #tpu.dimension_semantics<arbitrary>], iteration_bounds = array<i64: 2, 2>, scalar_prefetch = 0 : i64, scratch_operands = 6 : i64, tpu.core_type = #tpu.core_type<tc>, window_params = [{transform_indices = @transform_0, window_bounds = array<i64: 8, 256>}, {transform_indices = @transform_1, window_bounds = array<i64: 8, 256>}, {transform_indices = @transform_2, window_bounds = array<i64: 1, 8, 128>}]} {
    %c2_i32 = arith.constant 2 : i32
    %0 = arith.muli %arg0, %c2_i32 : i32
    %1 = arith.addi %0, %arg1 : i32
    %c0_i32 = arith.constant 0 : i32
    %2 = arith.cmpi eq, %arg1, %c0_i32 : i32
    %3 = arith.extui %2 : i1 to i32
    %c0_i32_0 = arith.constant 0 : i32
    %4 = arith.cmpi ne, %3, %c0_i32_0 : i32
    scf.if %4 {
      %cst = arith.constant 0.000000e+00 : f32
      %14 = vector.broadcast %cst : f32 to vector<8x1xf32>
      %c0 = arith.constant 0 : index
      %c0_6 = arith.constant 0 : index
      %15 = vector.load %arg5[%c0, %c0_6] : memref<8x1xf32, #tpu.memory_space<vmem>>, vector<8x1xf32>
      tpu.vector_store %arg5[%c0, %c0_6], %14 {strides = array<i32>} : memref<8x1xf32, #tpu.memory_space<vmem>>, vector<8x1xf32>,
      %cst_7 = arith.constant 0.000000e+00 : f32
      %16 = vector.broadcast %cst_7 : f32 to vector<8x1xf32>
      %c0_8 = arith.constant 0 : index
      %c0_9 = arith.constant 0 : index
      %17 = vector.load %arg6[%c0_8, %c0_9] : memref<8x1xf32, #tpu.memory_space<vmem>>, vector<8x1xf32>
      tpu.vector_store %arg6[%c0_8, %c0_9], %16 {strides = array<i32>} : memref<8x1xf32, #tpu.memory_space<vmem>>, vector<8x1xf32>,
      %cst_10 = arith.constant 0.000000e+00 : f32
      %18 = vector.broadcast %cst_10 : f32 to vector<8x1xf32>
      %c0_11 = arith.constant 0 : index
      %c0_12 = arith.constant 0 : index
      %19 = vector.load %arg7[%c0_11, %c0_12] : memref<8x1xf32, #tpu.memory_space<vmem>>, vector<8x1xf32>
      tpu.vector_store %arg7[%c0_11, %c0_12], %18 {strides = array<i32>} : memref<8x1xf32, #tpu.memory_space<vmem>>, vector<8x1xf32>,
      %cst_13 = arith.constant 0.000000e+00 : f32
      %20 = vector.broadcast %cst_13 : f32 to vector<8x1xf32>
      %c0_14 = arith.constant 0 : index
      %c0_15 = arith.constant 0 : index
      %21 = vector.load %arg8[%c0_14, %c0_15] : memref<8x1xf32, #tpu.memory_space<vmem>>, vector<8x1xf32>
      tpu.vector_store %arg8[%c0_14, %c0_15], %20 {strides = array<i32>} : memref<8x1xf32, #tpu.memory_space<vmem>>, vector<8x1xf32>,
      %cst_16 = arith.constant 0.000000e+00 : f32
      %22 = vector.broadcast %cst_16 : f32 to vector<8x1xf32>
      %c0_17 = arith.constant 0 : index
      %c0_18 = arith.constant 0 : index
      %23 = vector.load %arg9[%c0_17, %c0_18] : memref<8x1xf32, #tpu.memory_space<vmem>>, vector<8x1xf32>
      tpu.vector_store %arg9[%c0_17, %c0_18], %22 {strides = array<i32>} : memref<8x1xf32, #tpu.memory_space<vmem>>, vector<8x1xf32>,
      %cst_19 = arith.constant 0.000000e+00 : f32
      %24 = vector.broadcast %cst_19 : f32 to vector<8x1xf32>
      %c0_20 = arith.constant 0 : index
      %c0_21 = arith.constant 0 : index
      %25 = vector.load %arg10[%c0_20, %c0_21] : memref<8x1xf32, #tpu.memory_space<vmem>>, vector<8x1xf32>
      tpu.vector_store %arg10[%c0_20, %c0_21], %24 {strides = array<i32>} : memref<8x1xf32, #tpu.memory_space<vmem>>, vector<8x1xf32>,
    } else {
    }
    %c2_i32_1 = arith.constant 2 : i32
    %5 = arith.cmpi slt, %1, %c2_i32_1 : i32
    %6 = arith.extui %5 : i1 to i32
    %c0_i32_2 = arith.constant 0 : i32
    %7 = arith.cmpi ne, %6, %c0_i32_2 : i32
    scf.if %7 {
      %c0 = arith.constant 0 : index
      %c0_6 = arith.constant 0 : index
      %14 = vector.load %arg2[%c0, %c0_6] : memref<8x256xf32, #tpu.memory_space<vmem>>, vector<8x256xf32>
      %c0_7 = arith.constant 0 : index
      %c0_8 = arith.constant 0 : index
      %15 = vector.load %arg3[%c0_7, %c0_8] : memref<8x256xf32, #tpu.memory_space<vmem>>, vector<8x256xf32>
      %16 = arith.subf %14, %15 : vector<8x256xf32>
      %c0_9 = arith.constant 0 : index
      %c0_10 = arith.constant 0 : index
      %17 = vector.load %arg5[%c0_9, %c0_10] : memref<8x1xf32, #tpu.memory_space<vmem>>, vector<8x1xf32>
      %18 = arith.mulf %16, %16 : vector<8x256xf32>
      %cst = arith.constant dense<0.000000e+00> : vector<8xf32>
      %19 = vector.multi_reduction <add>, %18, %cst [1] : vector<8x256xf32> to vector<8xf32>
      %20 = vector.shape_cast %19 : vector<8xf32> to vector<8x1xf32>
      %21 = arith.addf %17, %20 : vector<8x1xf32>
      %c0_11 = arith.constant 0 : index
      %c0_12 = arith.constant 0 : index
      %22 = vector.load %arg5[%c0_11, %c0_12] : memref<8x1xf32, #tpu.memory_space<vmem>>, vector<8x1xf32>
      tpu.vector_store %arg5[%c0_11, %c0_12], %21 {strides = array<i32>} : memref<8x1xf32, #tpu.memory_space<vmem>>, vector<8x1xf32>,
      %c0_13 = arith.constant 0 : index
      %c0_14 = arith.constant 0 : index
      %23 = vector.load %arg6[%c0_13, %c0_14] : memref<8x1xf32, #tpu.memory_space<vmem>>, vector<8x1xf32>
      %cst_15 = arith.constant dense<0.000000e+00> : vector<8xf32>
      %24 = vector.multi_reduction <add>, %14, %cst_15 [1] : vector<8x256xf32> to vector<8xf32>
      %25 = vector.shape_cast %24 : vector<8xf32> to vector<8x1xf32>
      %26 = arith.addf %23, %25 : vector<8x1xf32>
      %c0_16 = arith.constant 0 : index
      %c0_17 = arith.constant 0 : index
      %27 = vector.load %arg6[%c0_16, %c0_17] : memref<8x1xf32, #tpu.memory_space<vmem>>, vector<8x1xf32>
      tpu.vector_store %arg6[%c0_16, %c0_17], %26 {strides = array<i32>} : memref<8x1xf32, #tpu.memory_space<vmem>>, vector<8x1xf32>,
      %c0_18 = arith.constant 0 : index
      %c0_19 = arith.constant 0 : index
      %28 = vector.load %arg7[%c0_18, %c0_19] : memref<8x1xf32, #tpu.memory_space<vmem>>, vector<8x1xf32>
      %cst_20 = arith.constant dense<0.000000e+00> : vector<8xf32>
      %29 = vector.multi_reduction <add>, %15, %cst_20 [1] : vector<8x256xf32> to vector<8xf32>
      %30 = vector.shape_cast %29 : vector<8xf32> to vector<8x1xf32>
      %31 = arith.addf %28, %30 : vector<8x1xf32>
      %c0_21 = arith.constant 0 : index
      %c0_22 = arith.constant 0 : index
      %32 = vector.load %arg7[%c0_21, %c0_22] : memref<8x1xf32, #tpu.memory_space<vmem>>, vector<8x1xf32>
      tpu.vector_store %arg7[%c0_21, %c0_22], %31 {strides = array<i32>} : memref<8x1xf32, #tpu.memory_space<vmem>>, vector<8x1xf32>,
      %c0_23 = arith.constant 0 : index
      %c0_24 = arith.constant 0 : index
      %33 = vector.load %arg8[%c0_23, %c0_24] : memref<8x1xf32, #tpu.memory_space<vmem>>, vector<8x1xf32>
      %34 = arith.mulf %14, %15 : vector<8x256xf32>
      %cst_25 = arith.constant dense<0.000000e+00> : vector<8xf32>
      %35 = vector.multi_reduction <add>, %34, %cst_25 [1] : vector<8x256xf32> to vector<8xf32>
      %36 = vector.shape_cast %35 : vector<8xf32> to vector<8x1xf32>
      %37 = arith.addf %33, %36 : vector<8x1xf32>
      %c0_26 = arith.constant 0 : index
      %c0_27 = arith.constant 0 : index
      %38 = vector.load %arg8[%c0_26, %c0_27] : memref<8x1xf32, #tpu.memory_space<vmem>>, vector<8x1xf32>
      tpu.vector_store %arg8[%c0_26, %c0_27], %37 {strides = array<i32>} : memref<8x1xf32, #tpu.memory_space<vmem>>, vector<8x1xf32>,
      %c0_28 = arith.constant 0 : index
      %c0_29 = arith.constant 0 : index
      %39 = vector.load %arg9[%c0_28, %c0_29] : memref<8x1xf32, #tpu.memory_space<vmem>>, vector<8x1xf32>
      %40 = arith.mulf %14, %14 : vector<8x256xf32>
      %cst_30 = arith.constant dense<0.000000e+00> : vector<8xf32>
      %41 = vector.multi_reduction <add>, %40, %cst_30 [1] : vector<8x256xf32> to vector<8xf32>
      %42 = vector.shape_cast %41 : vector<8xf32> to vector<8x1xf32>
      %43 = arith.addf %39, %42 : vector<8x1xf32>
      %c0_31 = arith.constant 0 : index
      %c0_32 = arith.constant 0 : index
      %44 = vector.load %arg9[%c0_31, %c0_32] : memref<8x1xf32, #tpu.memory_space<vmem>>, vector<8x1xf32>
      tpu.vector_store %arg9[%c0_31, %c0_32], %43 {strides = array<i32>} : memref<8x1xf32, #tpu.memory_space<vmem>>, vector<8x1xf32>,
      %c0_33 = arith.constant 0 : index
      %c0_34 = arith.constant 0 : index
      %45 = vector.load %arg10[%c0_33, %c0_34] : memref<8x1xf32, #tpu.memory_space<vmem>>, vector<8x1xf32>
      %46 = arith.mulf %15, %15 : vector<8x256xf32>
      %cst_35 = arith.constant dense<0.000000e+00> : vector<8xf32>
      %47 = vector.multi_reduction <add>, %46, %cst_35 [1] : vector<8x256xf32> to vector<8xf32>
      %48 = vector.shape_cast %47 : vector<8xf32> to vector<8x1xf32>
      %49 = arith.addf %45, %48 : vector<8x1xf32>
      %c0_36 = arith.constant 0 : index
      %c0_37 = arith.constant 0 : index
      %50 = vector.load %arg10[%c0_36, %c0_37] : memref<8x1xf32, #tpu.memory_space<vmem>>, vector<8x1xf32>
      tpu.vector_store %arg10[%c0_36, %c0_37], %49 {strides = array<i32>} : memref<8x1xf32, #tpu.memory_space<vmem>>, vector<8x1xf32>,
    } else {
    }
    %c2_i32_3 = arith.constant 2 : i32
    %8 = arith.cmpi eq, %1, %c2_i32_3 : i32
    %9 = arith.extui %8 : i1 to i32
    %c0_i32_4 = arith.constant 0 : i32
    %10 = arith.cmpi ne, %9, %c0_i32_4 : i32
    scf.if %10 {
      %c0 = arith.constant 0 : index
      %c0_6 = arith.constant 0 : index
      %14 = vector.load %arg2[%c0, %c0_6] : memref<8x256xf32, #tpu.memory_space<vmem>>, vector<8x256xf32>
      %c0_7 = arith.constant 0 : index
      %c0_8 = arith.constant 0 : index
      %15 = vector.load %arg3[%c0_7, %c0_8] : memref<8x256xf32, #tpu.memory_space<vmem>>, vector<8x256xf32>
      %16 = tpu.iota {dimensions = array<i32: 1>} : vector<8x256xi32>
      %c256_i32 = arith.constant 256 : i32
      %17 = arith.muli %1, %c256_i32 : i32
      %18 = vector.broadcast %17 : i32 to vector<8x256xi32>
      %19 = arith.addi %16, %18 : vector<8x256xi32>
      %c640_i32 = arith.constant 640 : i32
      %20 = vector.broadcast %c640_i32 : i32 to vector<8x256xi32>
      %21 = arith.cmpi slt, %19, %20 : vector<8x256xi32>
      %cst = arith.constant 0.000000e+00 : f32
      %22 = vector.broadcast %cst : f32 to vector<8x256xf32>
      %23 = arith.select %21, %14, %22 : vector<8x256xi1>, vector<8x256xf32>
      %cst_9 = arith.constant 0.000000e+00 : f32
      %24 = vector.broadcast %cst_9 : f32 to vector<8x256xf32>
      %25 = arith.select %21, %15, %24 : vector<8x256xi1>, vector<8x256xf32>
      %26 = arith.subf %23, %25 : vector<8x256xf32>
      %c0_10 = arith.constant 0 : index
      %c0_11 = arith.constant 0 : index
      %27 = vector.load %arg5[%c0_10, %c0_11] : memref<8x1xf32, #tpu.memory_space<vmem>>, vector<8x1xf32>
      %28 = arith.mulf %26, %26 : vector<8x256xf32>
      %cst_12 = arith.constant dense<0.000000e+00> : vector<8xf32>
      %29 = vector.multi_reduction <add>, %28, %cst_12 [1] : vector<8x256xf32> to vector<8xf32>
      %30 = vector.shape_cast %29 : vector<8xf32> to vector<8x1xf32>
      %31 = arith.addf %27, %30 : vector<8x1xf32>
      %c0_13 = arith.constant 0 : index
      %c0_14 = arith.constant 0 : index
      %32 = vector.load %arg5[%c0_13, %c0_14] : memref<8x1xf32, #tpu.memory_space<vmem>>, vector<8x1xf32>
      tpu.vector_store %arg5[%c0_13, %c0_14], %31 {strides = array<i32>} : memref<8x1xf32, #tpu.memory_space<vmem>>, vector<8x1xf32>,
      %c0_15 = arith.constant 0 : index
      %c0_16 = arith.constant 0 : index
      %33 = vector.load %arg6[%c0_15, %c0_16] : memref<8x1xf32, #tpu.memory_space<vmem>>, vector<8x1xf32>
      %cst_17 = arith.constant dense<0.000000e+00> : vector<8xf32>
      %34 = vector.multi_reduction <add>, %23, %cst_17 [1] : vector<8x256xf32> to vector<8xf32>
      %35 = vector.shape_cast %34 : vector<8xf32> to vector<8x1xf32>
      %36 = arith.addf %33, %35 : vector<8x1xf32>
      %c0_18 = arith.constant 0 : index
      %c0_19 = arith.constant 0 : index
      %37 = vector.load %arg6[%c0_18, %c0_19] : memref<8x1xf32, #tpu.memory_space<vmem>>, vector<8x1xf32>
      tpu.vector_store %arg6[%c0_18, %c0_19], %36 {strides = array<i32>} : memref<8x1xf32, #tpu.memory_space<vmem>>, vector<8x1xf32>,
      %c0_20 = arith.constant 0 : index
      %c0_21 = arith.constant 0 : index
      %38 = vector.load %arg7[%c0_20, %c0_21] : memref<8x1xf32, #tpu.memory_space<vmem>>, vector<8x1xf32>
      %cst_22 = arith.constant dense<0.000000e+00> : vector<8xf32>
      %39 = vector.multi_reduction <add>, %25, %cst_22 [1] : vector<8x256xf32> to vector<8xf32>
      %40 = vector.shape_cast %39 : vector<8xf32> to vector<8x1xf32>
      %41 = arith.addf %38, %40 : vector<8x1xf32>
      %c0_23 = arith.constant 0 : index
      %c0_24 = arith.constant 0 : index
      %42 = vector.load %arg7[%c0_23, %c0_24] : memref<8x1xf32, #tpu.memory_space<vmem>>, vector<8x1xf32>
      tpu.vector_store %arg7[%c0_23, %c0_24], %41 {strides = array<i32>} : memref<8x1xf32, #tpu.memory_space<vmem>>, vector<8x1xf32>,
      %c0_25 = arith.constant 0 : index
      %c0_26 = arith.constant 0 : index
      %43 = vector.load %arg8[%c0_25, %c0_26] : memref<8x1xf32, #tpu.memory_space<vmem>>, vector<8x1xf32>
      %44 = arith.mulf %23, %25 : vector<8x256xf32>
      %cst_27 = arith.constant dense<0.000000e+00> : vector<8xf32>
      %45 = vector.multi_reduction <add>, %44, %cst_27 [1] : vector<8x256xf32> to vector<8xf32>
      %46 = vector.shape_cast %45 : vector<8xf32> to vector<8x1xf32>
      %47 = arith.addf %43, %46 : vector<8x1xf32>
      %c0_28 = arith.constant 0 : index
      %c0_29 = arith.constant 0 : index
      %48 = vector.load %arg8[%c0_28, %c0_29] : memref<8x1xf32, #tpu.memory_space<vmem>>, vector<8x1xf32>
      tpu.vector_store %arg8[%c0_28, %c0_29], %47 {strides = array<i32>} : memref<8x1xf32, #tpu.memory_space<vmem>>, vector<8x1xf32>,
      %c0_30 = arith.constant 0 : index
      %c0_31 = arith.constant 0 : index
      %49 = vector.load %arg9[%c0_30, %c0_31] : memref<8x1xf32, #tpu.memory_space<vmem>>, vector<8x1xf32>
      %50 = arith.mulf %23, %23 : vector<8x256xf32>
      %cst_32 = arith.constant dense<0.000000e+00> : vector<8xf32>
      %51 = vector.multi_reduction <add>, %50, %cst_32 [1] : vector<8x256xf32> to vector<8xf32>
      %52 = vector.shape_cast %51 : vector<8xf32> to vector<8x1xf32>
      %53 = arith.addf %49, %52 : vector<8x1xf32>
      %c0_33 = arith.constant 0 : index
      %c0_34 = arith.constant 0 : index
      %54 = vector.load %arg9[%c0_33, %c0_34] : memref<8x1xf32, #tpu.memory_space<vmem>>, vector<8x1xf32>
      tpu.vector_store %arg9[%c0_33, %c0_34], %53 {strides = array<i32>} : memref<8x1xf32, #tpu.memory_space<vmem>>, vector<8x1xf32>,
      %c0_35 = arith.constant 0 : index
      %c0_36 = arith.constant 0 : index
      %55 = vector.load %arg10[%c0_35, %c0_36] : memref<8x1xf32, #tpu.memory_space<vmem>>, vector<8x1xf32>
      %56 = arith.mulf %25, %25 : vector<8x256xf32>
      %cst_37 = arith.constant dense<0.000000e+00> : vector<8xf32>
      %57 = vector.multi_reduction <add>, %56, %cst_37 [1] : vector<8x256xf32> to vector<8xf32>
      %58 = vector.shape_cast %57 : vector<8xf32> to vector<8x1xf32>
      %59 = arith.addf %55, %58 : vector<8x1xf32>
      %c0_38 = arith.constant 0 : index
      %c0_39 = arith.constant 0 : index
      %60 = vector.load %arg10[%c0_38, %c0_39] : memref<8x1xf32, #tpu.memory_space<vmem>>, vector<8x1xf32>
      tpu.vector_store %arg10[%c0_38, %c0_39], %59 {strides = array<i32>} : memref<8x1xf32, #tpu.memory_space<vmem>>, vector<8x1xf32>,
    } else {
    }
    %c1_i32 = arith.constant 1 : i32
    %11 = arith.cmpi eq, %arg1, %c1_i32 : i32
    %12 = arith.extui %11 : i1 to i32
    %c0_i32_5 = arith.constant 0 : i32
    %13 = arith.cmpi ne, %12, %c0_i32_5 : i32
    scf.if %13 {
      %14 = tpu.iota {dimensions = array<i32: 1>} : vector<8x128xi32>
      %c0_i32_6 = arith.constant 0 : i32
      %15 = vector.broadcast %c0_i32_6 : i32 to vector<8x128xi32>
      %16 = arith.cmpi eq, %14, %15 : vector<8x128xi32>
      %c0 = arith.constant 0 : index
      %c0_7 = arith.constant 0 : index
      %17 = vector.load %arg5[%c0, %c0_7] : memref<8x1xf32, #tpu.memory_space<vmem>>, vector<8x1xf32>
      %cst = arith.constant 0.000000e+00 : f32
      %18 = vector.shape_cast %17 : vector<8x1xf32> to vector<8x1xf32>
      %19 = vector.broadcast %18 : vector<8x1xf32> to vector<8x128xf32>
      %20 = vector.broadcast %cst : f32 to vector<8x128xf32>
      %21 = arith.select %16, %19, %20 : vector<8x128xi1>, vector<8x128xf32>
      %c1_i32_8 = arith.constant 1 : i32
      %22 = vector.broadcast %c1_i32_8 : i32 to vector<8x128xi32>
      %23 = arith.cmpi eq, %14, %22 : vector<8x128xi32>
      %c0_9 = arith.constant 0 : index
      %c0_10 = arith.constant 0 : index
      %24 = vector.load %arg6[%c0_9, %c0_10] : memref<8x1xf32, #tpu.memory_space<vmem>>, vector<8x1xf32>
      %cst_11 = arith.constant 0.000000e+00 : f32
      %25 = vector.shape_cast %24 : vector<8x1xf32> to vector<8x1xf32>
      %26 = vector.broadcast %25 : vector<8x1xf32> to vector<8x128xf32>
      %27 = vector.broadcast %cst_11 : f32 to vector<8x128xf32>
      %28 = arith.select %23, %26, %27 : vector<8x128xi1>, vector<8x128xf32>
      %29 = arith.addf %21, %28 : vector<8x128xf32>
      %c2_i32_12 = arith.constant 2 : i32
      %30 = vector.broadcast %c2_i32_12 : i32 to vector<8x128xi32>
      %31 = arith.cmpi eq, %14, %30 : vector<8x128xi32>
      %c0_13 = arith.constant 0 : index
      %c0_14 = arith.constant 0 : index
      %32 = vector.load %arg7[%c0_13, %c0_14] : memref<8x1xf32, #tpu.memory_space<vmem>>, vector<8x1xf32>
      %cst_15 = arith.constant 0.000000e+00 : f32
      %33 = vector.shape_cast %32 : vector<8x1xf32> to vector<8x1xf32>
      %34 = vector.broadcast %33 : vector<8x1xf32> to vector<8x128xf32>
      %35 = vector.broadcast %cst_15 : f32 to vector<8x128xf32>
      %36 = arith.select %31, %34, %35 : vector<8x128xi1>, vector<8x128xf32>
      %37 = arith.addf %29, %36 : vector<8x128xf32>
      %c3_i32 = arith.constant 3 : i32
      %38 = vector.broadcast %c3_i32 : i32 to vector<8x128xi32>
      %39 = arith.cmpi eq, %14, %38 : vector<8x128xi32>
      %c0_16 = arith.constant 0 : index
      %c0_17 = arith.constant 0 : index
      %40 = vector.load %arg8[%c0_16, %c0_17] : memref<8x1xf32, #tpu.memory_space<vmem>>, vector<8x1xf32>
      %cst_18 = arith.constant 0.000000e+00 : f32
      %41 = vector.shape_cast %40 : vector<8x1xf32> to vector<8x1xf32>
      %42 = vector.broadcast %41 : vector<8x1xf32> to vector<8x128xf32>
      %43 = vector.broadcast %cst_18 : f32 to vector<8x128xf32>
      %44 = arith.select %39, %42, %43 : vector<8x128xi1>, vector<8x128xf32>
      %45 = arith.addf %37, %44 : vector<8x128xf32>
      %c4_i32 = arith.constant 4 : i32
      %46 = vector.broadcast %c4_i32 : i32 to vector<8x128xi32>
      %47 = arith.cmpi eq, %14, %46 : vector<8x128xi32>
      %c0_19 = arith.constant 0 : index
      %c0_20 = arith.constant 0 : index
      %48 = vector.load %arg9[%c0_19, %c0_20] : memref<8x1xf32, #tpu.memory_space<vmem>>, vector<8x1xf32>
      %cst_21 = arith.constant 0.000000e+00 : f32
      %49 = vector.shape_cast %48 : vector<8x1xf32> to vector<8x1xf32>
      %50 = vector.broadcast %49 : vector<8x1xf32> to vector<8x128xf32>
      %51 = vector.broadcast %cst_21 : f32 to vector<8x128xf32>
      %52 = arith.select %47, %50, %51 : vector<8x128xi1>, vector<8x128xf32>
      %53 = arith.addf %45, %52 : vector<8x128xf32>
      %c5_i32 = arith.constant 5 : i32
      %54 = vector.broadcast %c5_i32 : i32 to vector<8x128xi32>
      %55 = arith.cmpi eq, %14, %54 : vector<8x128xi32>
      %c0_22 = arith.constant 0 : index
      %c0_23 = arith.constant 0 : index
      %56 = vector.load %arg10[%c0_22, %c0_23] : memref<8x1xf32, #tpu.memory_space<vmem>>, vector<8x1xf32>
      %cst_24 = arith.constant 0.000000e+00 : f32
      %57 = vector.shape_cast %56 : vector<8x1xf32> to vector<8x1xf32>
      %58 = vector.broadcast %57 : vector<8x1xf32> to vector<8x128xf32>
      %59 = vector.broadcast %cst_24 : f32 to vector<8x128xf32>
      %60 = arith.select %55, %58, %59 : vector<8x128xi1>, vector<8x128xf32>
      %61 = arith.addf %53, %60 : vector<8x128xf32>
      %c0_25 = arith.constant 0 : index
      %c0_26 = arith.constant 0 : index
      %c0_27 = arith.constant 0 : index
      %62 = vector.load %arg4[%c0_25, %c0_26, %c0_27] : memref<1x8x128xf32, #tpu.memory_space<vmem>>, vector<1x8x128xf32>
      %63 = vector.shape_cast %62 : vector<1x8x128xf32> to vector<8x128xf32>
      %64 = vector.shape_cast %61 : vector<8x128xf32> to vector<1x8x128xf32>
      tpu.vector_store %arg4[%c0_25, %c0_26, %c0_27], %64 {strides = array<i32>} : memref<1x8x128xf32, #tpu.memory_space<vmem>>, vector<1x8x128xf32>,
    } else {
    }
    return
  }
  func.func @transform_0(%arg0: i32, %arg1: i32) -> (i32, i32) {
    %c2_i32 = arith.constant 2 : i32
    %0 = arith.muli %arg0, %c2_i32 : i32
    %1 = arith.addi %0, %arg1 : i32
    %c2_i32_0 = arith.constant 2 : i32
    %2 = arith.minsi %1, %c2_i32_0 : i32
    %c0_i32 = arith.constant 0 : i32
    %c0_i32_1 = arith.constant 0 : i32
    return %c0_i32, %2 : i32, i32
  }
  func.func @transform_1(%arg0: i32, %arg1: i32) -> (i32, i32) {
    %c2_i32 = arith.constant 2 : i32
    %0 = arith.muli %arg0, %c2_i32 : i32
    %1 = arith.addi %0, %arg1 : i32
    %c2_i32_0 = arith.constant 2 : i32
    %2 = arith.minsi %1, %c2_i32_0 : i32
    %c0_i32 = arith.constant 0 : i32
    %c0_i32_1 = arith.constant 0 : i32
    return %c0_i32, %2 : i32, i32
  }
  func.func @transform_2(%arg0: i32, %arg1: i32) -> (i32, i32, i32) {
    %c0_i32 = arith.constant 0 : i32
    %c0_i32_0 = arith.constant 0 : i32
    %c0_i32_1 = arith.constant 0 : i32
    return %arg0, %c0_i32, %c0_i32_0 : i32, i32, i32
  }
}

</mosaic_0001>

<bundles_post_ra>
// kernel: tpu_custom_call.1
= control target key start
LH: loop header
LB: loop body
LE: loop exit
PB: predicated region body
PF: predicated region fallthrough
CT: control target
= control target key end

     0   :  { %7 = vsyncpa [#allocation9], 0  ;;  %s1228_s0 = inlined_call_operand.hbm [shape: f32[8,640], index: 0, kind: input, shape index: {}]   ;;  %s1229_s1 = inlined_call_operand.hbm [shape: f32[8,640], index: 1, kind: input, shape index: {}]   ;;  %s1230_s2 = inlined_call_operand.hbm [shape: f32[2,8,128], index: 2, kind: output, shape index: {}]  }
   0x1   :  { %9 = vsyncpa [#allocation9 + $0x1], 0 }
   0x2   :  { %10 = vsyncpa [#allocation12], 0 }
   0x3   :  { %12 = vsyncpa [#allocation12 + $0x1], 0 }
   0x4   :  { %13 = vsyncpa [#allocation10], 0 }
   0x5   :  { %15 = vsyncpa [#allocation10 + $0x1], 0  ;;  %s923_s9 = smov 0   ;;  %s925_s10 = smov 0  }
   0x6   :  { %s927_s11 = smov 0   ;;  %s929_s12 = smov 0  }
   0x7   :  { %s931_s13 = smov 0   ;;  %s933_s14 = smov 0  }
   0x8   :  { %s935_s15 = smov 0   ;;  %s937_s16 = smov 0  }
   0x9   :  { %s939_s17 = smov 0   ;;  %s941_s18 = smov 0  }
   0xa   :  { %s943_s19 = smov 0  }
   0xb LB: > { %1238 = sst [smem:[#allocation17_spill]] %s893_s17  ;;  %s578_s20 = sadd.s32 4294967295, %s901_s19   ;;  %s901_s19 = sphi %s943_s19, %s21_s19   ;;  %s897_s18 = sphi %s941_s18, %s1255_s18   ;;  %s893_s17 = sphi %s939_s17, %s1254_s17   ;;  %s889_s16 = sphi %s937_s16, %s1253_s16   ;;  %s885_s15 = sphi %s935_s15, %s1252_s15   ;;  %s881_s14 = sphi %s933_s14, %s1261_s14   ;;  %s877_s13 = sphi %s931_s13, %s1260_s13   ;;  %s873_s12 = sphi %s929_s12, %s1259_s12   ;;  %s869_s11 = sphi %s927_s11, %s1258_s11   ;;  %s865_s10 = sphi %s925_s10, %s1257_s10   ;;  %s861_s9 = sphi %s923_s9, %s1256_s9  }
   0xc   : > { %1239 = sst [smem:[#allocation18_spill]] %s897_s18  ;;  %s579_s21 = sadd.s32 4294967294, %s901_s19  }
   0xd   : > { %s30_s22 = sadd.s32 1, %s893_s17  ;;  %s33_s23 = sadd.s32 1, %s897_s18 }
   0xe   : > { %p31_p0 = scmp.ge.s32.totalorder %s30_s22, 2  ;;  %s580_s24 = sshll.u32 %s897_s18, 1 }
   0xf   : > { %s38_s25 = sadd.s32 %s893_s17, %s580_s24  ;;  %s48_s26 = sadd.s32 1, %s881_s14 }
  0x10   : > { %s1263_s22 = smov (%p31_p0, %s30_s22), 0  ;;  %s1265_s23 = smov (!%p31_p0, %s33_s23), %s897_s18 }
  0x11   : > { %1240 = sst [smem:[#allocation19_spill]] %s1263_s22  ;;  %p39_p1 = scmp.lt.s32.totalorder %s38_s25, 2 }
  0x12   : > { %p55_p2 = scmp.ne.s32.totalorder %s881_s14, %s877_s13  ;;  %p35_p3 = scmp.ge.s32.totalorder %s1265_s23, 2 }
  0x13   : > { %p56_p4 = scmp.eq.s32.totalorder %s901_s19, 0  ;;  %s1267_s25 = smov (!%p39_p1, %s38_s25), 2 }
  0x14   : > { %s1269_s23 = smov (%p35_p3, %s1265_s23), 0  ;;  %p61_p6 = scmp.ne.s32.totalorder %s877_s13, %s873_s12 }
  0x15   : > { %1241 = sst [smem:[#allocation20_spill]] %s1269_s23  ;;  %p995_p5 = por %p56_p4, %p55_p2 }
  0x16   : > { %s581_s28 = sshll.u32 %s1269_s23, 1  ;;  %p62_p7 = scmp.eq.s32.totalorder %s578_s20, 0 }
  0x17   : > { %s1242_s27 = scalar_select %p995_p5, 1, 0 }
  0x18   : > { %s42_s29 = sadd.s32 %s581_s28, %s1263_s22  ;;  %s105_s30 = ssub.s32 %s897_s18, %s1269_s23 }
  0x19   : > { %p43_p8 = scmp.lt.s32.totalorder %s42_s29, 2  ;;  %p1007_p9 = por %p62_p7, %p61_p6 }
  0x1a   : > { %p106_p10 = scmp.eq.s32.totalorder %s105_s30, 0  ;;  %s108_s4 = sadd.s32 1, %s869_s11 }
  0x1b   : > { %s1243_s3 = scalar_select %p1007_p9, 1, 0 }
  0x1c   : > { %s1271_s29 = smov (!%p43_p8, %s42_s29), 2  ;;  %p118_p11 = scmp.ne.s32.totalorder %s869_s11, %s865_s10 }
  0x1d   : > { %s1013_s5 = scalar_select %p106_p10, %s869_s11, %s108_s4  }
  0x1e   : > { %s45_s6 = ssub.s32 %s1267_s25, %s1271_s29  ;;  %p119_p13 = scmp.eq.s32.totalorder %s578_s20, 3 }
  0x1f   : > { %p46_p12 = scmp.eq.s32.totalorder %s45_s6, 0  ;;  %p124_p0 = scmp.ne.s32.totalorder %s865_s10, %s861_s9 }
  0x20   : > { %p125_p1 = scmp.eq.s32.totalorder %s579_s21, 3  ;;  %p1027_p2 = por %p119_p13, %p118_p11 }
  0x21   : > { %s1025_s7 = scalar_select %p46_p12, %s881_s14, %s48_s26  }
  0x22   : > { %s1245_s8 = scalar_select %p1027_p2, 1, 0 }
  0x23   : > { %1244 = sst [smem:[#allocation21_spill]] %s1025_s7  ;;  %p1031_p3 = por %p125_p1, %p124_p0 }
  0x24   : > { %p585_p4 = scmp.ge.s32.totalorder %s901_s19, 4 }
  0x25   : > { %s1246_s12 = scalar_select %p1031_p3, 1, 0 }
  0x26   : > { %141 = sbr.rel (%p585_p4) target bundleno = 115 (0x73), region = 16 }
  0x2d   : > { %144 = sbr.rel (!%p995_p5) target bundleno = 79 (0x4f), region = 20  ;;  %s145_s20 = sand.u32 (%p995_p5), 1, %s881_s14  }
  0x2e   : > { %s588_s21 = sshll.u32 (%p995_p5), %s1267_s25, 1  ;;  %s586_s24 = sshll.u32 (%p995_p5), %s145_s20, 4 }
  0x2f   : > { %s155_s26 = ssub.s32 (%p995_p5), 5, %s588_s21  ;;  %s1043_s30 = scalar_lea.sflag (%p995_p5), [#allocation9], %s145_s20 }
  0x30   : > { %p156_p6 = scmp.lt.s32.totalorder (%p995_p5), %s155_s26, 2  ;;  %s149_s4 = scalar_lea.vmem (%p995_p5), [#allocation8], %s586_s24 }
  0x34   : > { %s1273_s26 = smov (!%p156_p6, %s155_s26), 2 }
  0x35   : > { %s1040_s28 = sshll.u32 %s1273_s26, 7 }
  0x36   : > { %s160_s29 = ssub.s32 256, %s1040_s28 }
  0x37   : > { %161 = vsyncadd %s1043_s30, %s160_s29  ;;  %p590_p7 = scmp.ne.s32.totalorder %s1040_s28, 0  ;;  %s616_s6 = sshll.u32 %s1267_s25, 8 }
  0x38   : > { %s1051_s21 = scalar_lea.hbm %s1228_s0, %s616_s6  ;;  %s167_s20 = sshll.u32 %s149_s4, 4  ;;  %s168_s20 = int_to_ptr.vmem [resolvable:$true] %s167_s20 }
  0x39   : > { %s719_s26 = scalar_lea.hbm %s1051_s21, %s1040_s28  ;;  %s723_s18 = scalar_lea.hbm %s1228_s0, 640 }
  0x3a   : > { %p720_p8 = scmp.ne.s32.totalorder %s1051_s21, %s719_s26  ;;  %p724_p12 = scmp.lt.u32.totalorder %s1051_s21, %s1228_s0 }
  0x3b   : > { %p725_p13 = scmp.lt.u32.totalorder %s723_s18, %s719_s26  ;;  %p727_p1 = scmp.lt.u32.totalorder %s719_s26, %s1051_s21 }
  0x3c   : > { %p721_p10 = pnand %p720_p8, %p590_p7 }
  0x3d   : > { %p726_p0 = por %p725_p13, %p724_p12 }
  0x3e   : > { %p722_p11 = pneg %p721_p10 }
  0x3f   : > { %p728_p4 = por %p727_p1, %p726_p0 }
  0x41   : > { %p729_p6 = pnand %p728_p4, %p722_p11 }
  0x43   : > { %732 = shalt.err (!%p729_p6)
}
  0x44   : > { %s733_s22 = scalar_lea.vmem %s168_s20, %s1040_s28  ;;  %s903_s23 = smov [#allocation8]  }
  0x45   : > { %p734_p3 = scmp.ne.s32.totalorder %s168_s20, %s733_s22  ;;  %s737_s4 = sshll.u32 %s903_s23, 4  ;;  %s738_s4 = int_to_ptr.vmem [resolvable:$false] %s737_s4 }
  0x46   : > { %s739_s6 = scalar_lea.vmem %s738_s4, 512  ;;  %p740_p2 = scmp.lt.s32.totalorder %s168_s20, %s738_s4 }
  0x47   : > { %p735_p8 = pnand %p734_p3, %p590_p7  ;;  %p741_p9 = scmp.lt.s32.totalorder %s739_s6, %s733_s22 }
  0x49   : > { %p736_p10 = pneg %p735_p8  ;;  %p742_p5 = por %p741_p9, %p740_p2 }
  0x4b   : > { %p743_p12 = pnand %p742_p5, %p736_p10 }
  0x4d   : > { %746 = shalt.err (!%p743_p12)
}
  0x4e   : > { %170 = dma.hbm_to_vmem [thread:$0]  (%p590_p7), %s1051_s21, %s1040_s28, %s168_s20, %s1043_s30  }
  0x4f PF: > { %p1247_p11 = scmp.ne.s32.totalorder %s1242_s27, 0 }
  0x50   : > { %s174_s17 = sand.u32 (%p1247_p11), 1, %s881_s14   ;;  %s596_s18 = sshll.u32 (%p1247_p11), %s1267_s25, 1 }
  0x51   : > { %173 = sbr.rel (!%p1247_p11) target bundleno = 115 (0x73), region = 24  ;;  %s594_s7 = sshll.u32 (%p1247_p11), %s174_s17, 4 }
  0x52   : > { %s184_s26 = ssub.s32 (%p1247_p11), 5, %s596_s18  ;;  %s1081_s22 = scalar_lea.sflag (%p1247_p11), [#allocation12], %s174_s17 }
  0x53   : > { %p185_p3 = scmp.lt.s32.totalorder (%p1247_p11), %s184_s26, 2  ;;  %s178_s28 = scalar_lea.vmem (%p1247_p11), [#allocation11], %s594_s7 }
  0x58   : > { %s1275_s26 = smov (!%p185_p3, %s184_s26), 2 }
  0x59   : > { %s1078_s24 = sshll.u32 %s1275_s26, 7 }
  0x5a   : > { %s189_s29 = ssub.s32 256, %s1078_s24 }
  0x5b   : > { %190 = vsyncadd %s1081_s22, %s189_s29  ;;  %p598_p5 = scmp.ne.s32.totalorder %s1078_s24, 0  ;;  %s617_s27 = sshll.u32 %s1267_s25, 8 }
  0x5c   : > { %s1089_s20 = scalar_lea.hbm %s1229_s1, %s617_s27  ;;  %s196_s23 = sshll.u32 %s178_s28, 4  ;;  %s197_s23 = int_to_ptr.vmem [resolvable:$true] %s196_s23 }
  0x5d   : > { %s747_s4 = scalar_lea.hbm %s1089_s20, %s1078_s24  ;;  %s751_s25 = scalar_lea.hbm %s1229_s1, 640 }
  0x5e   : > { %p748_p9 = scmp.ne.s32.totalorder %s1089_s20, %s747_s4  ;;  %p752_p13 = scmp.lt.u32.totalorder %s1089_s20, %s1229_s1 }
  0x5f   : > { %p753_p0 = scmp.lt.u32.totalorder %s751_s25, %s747_s4  ;;  %p755_p4 = scmp.lt.u32.totalorder %s747_s4, %s1089_s20 }
  0x60   : > { %p749_p2 = pnand %p748_p9, %p598_p5 }
  0x61   : > { %p754_p1 = por %p753_p0, %p752_p13 }
  0x62   : > { %p750_p7 = pneg %p749_p2 }
  0x63   : > { %p756_p6 = por %p755_p4, %p754_p1 }
  0x65   : > { %p757_p8 = pnand %p756_p6, %p750_p7 }
  0x67   : > { %760 = shalt.err (!%p757_p8)
}
  0x68   : > { %s761_s26 = scalar_lea.vmem %s197_s23, %s1078_s24  ;;  %s904_s29 = smov [#allocation11]  }
  0x69   : > { %p762_p10 = scmp.ne.s32.totalorder %s197_s23, %s761_s26  ;;  %s765_s28 = sshll.u32 %s904_s29, 4  ;;  %s766_s28 = int_to_ptr.vmem [resolvable:$false] %s765_s28 }
  0x6a   : > { %s767_s27 = scalar_lea.vmem %s766_s28, 512  ;;  %p768_p3 = scmp.lt.s32.totalorder %s197_s23, %s766_s28 }
  0x6b   : > { %p763_p12 = pnand %p762_p10, %p598_p5  ;;  %p769_p9 = scmp.lt.s32.totalorder %s767_s27, %s761_s26 }
  0x6d   : > { %p764_p11 = pneg %p763_p12  ;;  %p770_p2 = por %p769_p9, %p768_p3 }
  0x6f   : > { %p771_p0 = pnand %p770_p2, %p764_p11 }
  0x71   : > { %774 = shalt.err (!%p771_p0)
}
  0x72   : > { %199 = dma.hbm_to_vmem [thread:$0]  (%p598_p5), %s1089_s20, %s1078_s24, %s197_s23, %s1081_s22  }
  0x73 PF: > { %p602_p7 = scmp.ge.s32.totalorder %s901_s19, 1  ;;  %p201_p13 = scmp.lt.s32.totalorder %s901_s19, 5 }
  0x75   : > { %p202_p1 = pnand %p602_p7, %p201_p13 }
  0x76   : > { %s207_s30 = sand.u32 (!%p202_p1), 1, %s877_s13   ;;  %p1248_p4 = scmp.ne.s32.totalorder (!%p202_p1), %s1243_s3, 0 }
  0x77   : > { %205 = sbr.rel (%p202_p1) target bundleno = 637 (0x27d), region = 28  ;;  %s603_s21 = sshll.u32 (!%p202_p1), %s207_s30, 4 }
  0x78   : > { %s208_s4 = scalar_lea.sflag (!%p202_p1), [#allocation9], %s207_s30  ;;  %s1115_s6 = scalar_lea.vmem (!%p202_p1), [#allocation8], %s603_s21 }
  0x7e   : > { %848 = dma.done.wait (%p1248_p4), %s208_s4, 256  }
  0x7f   : > { %850 = vsyncadd (%p1248_p4), %s208_s4, 4294967040  ;;  %s217_s24 = scalar_lea.sflag [#allocation12], %s207_s30  ;;  %s1121_s22 = scalar_lea.vmem [#allocation11], %s603_s21 }
  0x80   : > { %852 = dma.done.wait (%p1248_p4), %s217_s24, 256  }
  0x81   : > { %854 = vsyncadd (%p1248_p4), %s217_s24, 4294967040  ;;  %s243_s20 = sand.u32 1, %s865_s10   ;;  %s606_s23 = sshll.u32 %s889_s16, 1 }
  0x82   : > { %s1131_s17 = sshll.u32 %s243_s20, 3  ;;  %s1134_s25 = sadd.s32 %s885_s15, %s606_s23 }
  0x83   : > { %s245_s18 = scalar_lea.vmem [#allocation13], %s1131_s17  ;;  %p607_p5 = scmp.ne.s32.totalorder %s885_s15, 0 }
  0x84   : > { %vm270_vm0 = vcmask (!%p607_p5), 7168   ;;  %v905_v0 = vmov (!%p607_p5), 0.0  }
  0x85   : > { %269 = sbr.rel (%p607_p5) target bundleno = 140 (0x8c), region = 40  ;;  %271 = vst.msk [vmem:[#allocation2] sm:$0xff] (!%p607_p5), %vm270_vm0, %v905_v0  ;;  %272 = vst.msk [vmem:[#allocation3] sm:$0xff] (!%p607_p5), %vm270_vm0, %v905_v0 }
  0x86   : > { %273 = vst.msk [vmem:[#allocation4] sm:$0xff] (!%p607_p5), %vm270_vm0, %v905_v0  ;;  %274 = vst.msk [vmem:[#allocation5] sm:$0xff] (!%p607_p5), %vm270_vm0, %v905_v0 }
  0x87   : > { %275 = vst.msk [vmem:[#allocation6] sm:$0xff] (!%p607_p5), %vm270_vm0, %v905_v0  ;;  %276 = vst.msk [vmem:[#allocation7] sm:$0xff] (!%p607_p5), %vm270_vm0, %v905_v0 }
  0x8c PF: > { %p608_p6 = scmp.ge.s32.totalorder %s1134_s25, 2 }
  0x8d   : > { %v283_v1 = vld [vmem:[%s1121_s22] sm:$0xff] (!%p608_p6)  ;;  %v284_v2 = vld [vmem:[%s1121_s22 + $0x8] sm:$0xff] (!%p608_p6)  ;;  %vm294_vm1 = vcmask (!%p608_p6), 7168  }
  0x8e   : > { %280 = sbr.rel (%p608_p6) target bundleno = 299 (0x12b), region = 44  ;;  %v281_v3 = vld [vmem:[%s1115_s6] sm:$0xff] (!%p608_p6)  ;;  %v303_v4 = vadd.f32 (!%p608_p6), %v284_v2, %v283_v1  ;;  %v282_v5 = vld [vmem:[%s1115_s6 + $0x8] sm:$0xff] (!%p608_p6)  ;;  %v325_v12 = vmul.f32 (!%p608_p6), %v283_v1, %v283_v1  ;;  %v326_v13 = vmul.f32 (!%p608_p6), %v284_v2, %v284_v2 }
  0x8f   : > { %v309_v6 = vmul.f32 (!%p608_p6), %v283_v1, %v281_v3  ;;  %v285_v7 = vsub.f32 (!%p608_p6), %v281_v3, %v283_v1  ;;  %v297_v8 = vadd.f32 (!%p608_p6), %v282_v5, %v281_v3  ;;  %v310_v9 = vmul.f32 (!%p608_p6), %v284_v2, %v282_v5  ;;  %v302_v21 = vld [vmem:[#allocation4] sm:$0xff] (!%p608_p6)  ;;  %v296_v22 = vld [vmem:[#allocation3] sm:$0xff] (!%p608_p6)  ;;  %v308_v27 = vld [vmem:[#allocation5] sm:$0xff] (!%p608_p6) }
  0x90   : > { %v286_v10 = vsub.f32 (!%p608_p6), %v282_v5, %v284_v2  ;;  %304 = vadd.xlane.f32.xlu1 (!%p608_p6), %v303_v4  ;;  %v317_v16 = vmul.f32 (!%p608_p6), %v281_v3, %v281_v3  ;;  %v318_v17 = vmul.f32 (!%p608_p6), %v282_v5, %v282_v5  ;;  %v327_v19 = vadd.f32 (!%p608_p6), %v326_v13, %v325_v12  ;;  %v287_v28 = vld [vmem:[#allocation2] sm:$0xff] (!%p608_p6)  ;;  %v324_v33 = vld [vmem:[#allocation7] sm:$0xff] (!%p608_p6) }
  0x91   : > { %v288_v11 = vmul.f32 (!%p608_p6), %v285_v7, %v285_v7  ;;  %298 = vadd.xlane.f32.xlu0 (!%p608_p6), %v297_v8  ;;  %v311_v14 = vadd.f32 (!%p608_p6), %v310_v9, %v309_v6  ;;  %v316_v34 = vld [vmem:[#allocation6] sm:$0xff] (!%p608_p6) }
  0x92   : > { %v289_v15 = vmul.f32 (!%p608_p6), %v286_v10, %v286_v10  ;;  %v319_v20 = vadd.f32 (!%p608_p6), %v318_v17, %v317_v16 }
  0x94   : > { %v290_v18 = vadd.f32 (!%p608_p6), %v289_v15, %v288_v11  ;;  %312 = vadd.xlane.f32.xlu1 (!%p608_p6), %v311_v14 }
  0x96   : > { %291 = vadd.xlane.f32.xlu0 %v290_v18 }
  0x98   : > { %328 = vadd.xlane.f32.xlu1 %v327_v19 }
  0x9a   : > { %320 = vadd.xlane.f32.xlu0 %v319_v20 }
 0x11d   : > { %v305_v23 = vpop.xlane.xlu1 %304 }
 0x11e   : > { %v306_v24 = vadd.f32 %v305_v23, %v302_v21  ;;  %v299_v25 = vpop.xlane.xlu0 %298 }
 0x11f   : > { %v300_v26 = vadd.f32 %v299_v25, %v296_v22 }
 0x120   : > { %307 = vst.msk [vmem:[#allocation4] sm:$0xff] %vm294_vm1, %v306_v24 }
 0x121   : > { %301 = vst.msk [vmem:[#allocation3] sm:$0xff] %vm294_vm1, %v300_v26  ;;  %v313_v29 = vpop.xlane.xlu1 %312 }
 0x122   : > { %v314_v30 = vadd.f32 %v313_v29, %v308_v27 }
 0x123   : > { %v292_v31 = vpop.xlane.xlu0 %291 }
 0x124   : > { %v293_v32 = vadd.f32 %v292_v31, %v287_v28  ;;  %315 = vst.msk [vmem:[#allocation5] sm:$0xff] %vm294_vm1, %v314_v30 }
 0x125   : > { %v329_v35 = vpop.xlane.xlu1 %328 }
 0x126   : > { %295 = vst.msk [vmem:[#allocation2] sm:$0xff] %vm294_vm1, %v293_v32  ;;  %v330_v36 = vadd.f32 %v329_v35, %v324_v33 }
 0x127   : > { %v321_v37 = vpop.xlane.xlu0 %320 }
 0x128   : > { %v322_v38 = vadd.f32 %v321_v37, %v316_v34  ;;  %331 = vst.msk [vmem:[#allocation7] sm:$0xff] %vm294_vm1, %v330_v36 }
 0x12a   : > { %323 = vst.msk [vmem:[#allocation6] sm:$0xff] %vm294_vm1, %v322_v38 }
 0x12b PF: > { %p609_p8 = scmp.ne.s32.totalorder %s1134_s25, 2 }
 0x12c   : > { %v340_v39 = vlaneseq (!%p609_p8)  ;;  %s610_s3 = sshll.u32 (!%p609_p8), %s1134_s25, 8  ;;  %v338_v42 = vld [vmem:[%s1121_s22] sm:$0xff] (!%p609_p8)  ;;  %v339_v46 = vld [vmem:[%s1121_s22 + $0x8] sm:$0xff] (!%p609_p8)  ;;  %vm362_vm4 = vcmask (!%p609_p8), 7168  }
 0x12d   : > { %335 = sbr.rel (%p609_p8) target bundleno = 465 (0x1d1), region = 48  ;;  %v344_v40 = vstv (!%p609_p8), %s610_s3  ;;  %v336_v45 = vld [vmem:[%s1115_s6] sm:$0xff] (!%p609_p8)  ;;  %v337_v48 = vld [vmem:[%s1115_s6 + $0x8] sm:$0xff] (!%p609_p8) }
 0x12e   : > { %v341_v41 = vand.u32 (!%p609_p8), 127, %v340_v39  ;;  %v370_v5 = vld [vmem:[#allocation4] sm:$0xff] (!%p609_p8)  ;;  %v364_v6 = vld [vmem:[#allocation3] sm:$0xff] (!%p609_p8)  ;;  %v376_v11 = vld [vmem:[#allocation5] sm:$0xff] (!%p609_p8) }
 0x12f   : > { %v355_v12 = vld [vmem:[#allocation2] sm:$0xff] (!%p609_p8)  ;;  %v392_v17 = vld [vmem:[#allocation7] sm:$0xff] (!%p609_p8) }
 0x130   : > { %v342_v43 = vadd.s32 (!%p609_p8), 128, %v341_v41  ;;  %v345_v44 = vadd.s32 (!%p609_p8), %v344_v40, %v341_v41 }
 0x131   : > { %v384_v18 = vld [vmem:[#allocation6] sm:$0xff] (!%p609_p8) }
 0x132   : > { %v346_v47 = vadd.s32 (!%p609_p8), %v344_v40, %v342_v43  ;;  %vm347_vm2 = vcmp.lt.s32.totalorder (!%p609_p8), %v345_v44, 640 }
 0x133   : > { %v351_v49 = vsel (!%p609_p8), %vm347_vm2, %v338_v42, 0.0  ;;  %v349_v50 = vsel (!%p609_p8), %vm347_vm2, %v336_v45, 0.0 }
 0x134   : > { %vm348_vm3 = vcmp.lt.s32.totalorder %v346_v47, 640  ;;  %v377_v51 = vmul.f32 %v351_v49, %v349_v50  ;;  %v353_v52 = vsub.f32 %v349_v50, %v351_v49  ;;  %v393_v60 = vmul.f32 %v351_v49, %v351_v49 }
 0x135   : > { %v352_v53 = vsel %vm348_vm3, %v339_v46, 0.0  ;;  %v350_v54 = vsel %vm348_vm3, %v337_v48, 0.0  ;;  %v385_v62 = vmul.f32 %v349_v50, %v349_v50 }
 0x136   : > { %v371_v55 = vadd.f32 %v352_v53, %v351_v49  ;;  %v365_v56 = vadd.f32 %v350_v54, %v349_v50  ;;  %v378_v57 = vmul.f32 %v352_v53, %v350_v54  ;;  %v354_v58 = vsub.f32 %v350_v54, %v352_v53 }
 0x137   : > { %v356_v59 = vmul.f32 %v353_v52, %v353_v52  ;;  %v394_v61 = vmul.f32 %v352_v53, %v352_v53  ;;  %v386_v1 = vmul.f32 %v350_v54, %v350_v54 }
 0x138   : > { %372 = vadd.xlane.f32.xlu1 %v371_v55  ;;  %366 = vadd.xlane.f32.xlu0 %v365_v56  ;;  %v379_v63 = vadd.f32 %v378_v57, %v377_v51  ;;  %v357_v0 = vmul.f32 %v354_v58, %v354_v58 }
 0x139   : > { %v395_v3 = vadd.f32 %v394_v61, %v393_v60  ;;  %v387_v4 = vadd.f32 %v386_v1, %v385_v62 }
 0x13a   : > { %v358_v2 = vadd.f32 %v357_v0, %v356_v59 }
 0x13c   : > { %380 = vadd.xlane.f32.xlu1 %v379_v63  ;;  %359 = vadd.xlane.f32.xlu0 %v358_v2 }
 0x140   : > { %396 = vadd.xlane.f32.xlu1 %v395_v3  ;;  %388 = vadd.xlane.f32.xlu0 %v387_v4 }
 0x1c5   : > { %v373_v7 = vpop.xlane.xlu1 %372  ;;  %v367_v8 = vpop.xlane.xlu0 %366 }
 0x1c6   : > { %v374_v9 = vadd.f32 %v373_v7, %v370_v5  ;;  %v368_v10 = vadd.f32 %v367_v8, %v364_v6 }
 0x1c8   : > { %375 = vst.msk [vmem:[#allocation4] sm:$0xff] %vm362_vm4, %v374_v9  ;;  %369 = vst.msk [vmem:[#allocation3] sm:$0xff] %vm362_vm4, %v368_v10 }
 0x1c9   : > { %v381_v13 = vpop.xlane.xlu1 %380  ;;  %v360_v14 = vpop.xlane.xlu0 %359 }
 0x1ca   : > { %v382_v15 = vadd.f32 %v381_v13, %v376_v11  ;;  %v361_v16 = vadd.f32 %v360_v14, %v355_v12 }
 0x1cc   : > { %383 = vst.msk [vmem:[#allocation5] sm:$0xff] %vm362_vm4, %v382_v15  ;;  %363 = vst.msk [vmem:[#allocation2] sm:$0xff] %vm362_vm4, %v361_v16 }
 0x1cd   : > { %v397_v19 = vpop.xlane.xlu1 %396  ;;  %v389_v20 = vpop.xlane.xlu0 %388 }
 0x1ce   : > { %v398_v21 = vadd.f32 %v397_v19, %v392_v17  ;;  %v390_v22 = vadd.f32 %v389_v20, %v384_v18 }
 0x1d0   : > { %399 = vst.msk [vmem:[#allocation7] sm:$0xff] %vm362_vm4, %v398_v21  ;;  %391 = vst.msk [vmem:[#allocation6] sm:$0xff] %vm362_vm4, %v390_v22 }
 0x1d1 PF: > { %p611_p10 = scmp.ne.s32.totalorder %s885_s15, 1 }
 0x1d2   : > { %v424_v23 = vld [vmem:[#allocation4] sm:$0xff] (!%p611_p10)  ;;  %v906_v25 = vmov (!%p611_p10), 0   ;;  %v415_v27 = vld [vmem:[#allocation3] sm:$0xff] (!%p611_p10)  ;;  %v404_v30 = vlaneseq (!%p611_p10) }
 0x1d3   : > { %403 = sbr.rel (%p611_p10) target bundleno = 612 (0x264), region = 52  ;;  %v407_v24 = vld [vmem:[#allocation2] sm:$0xff] (!%p611_p10)  ;;  %718 = vset.pattern.permute.xlu1 (!%p611_p10), %v906_v25  ;;  %717 = vset.pattern.permute.xlu0 (!%p611_p10), %v906_v25  ;;  %v433_v26 = vld [vmem:[#allocation5] sm:$0xff] (!%p611_p10) }
 0x1d4   : > { %427 = vperm.xlu1 (!%p611_p10), %718, %v424_v23   ;;  %410 = vperm.xlu0 (!%p611_p10), %717, %v407_v24   ;;  %v405_v31 = vand.u32 (!%p611_p10), 127, %v404_v30 }
 0x1d6   : > { %vm406_vm5 = vcmp.eq.s32.totalorder (!%p611_p10), %v405_v31, 0  ;;  %vm414_vm6 = vcmp.eq.s32.totalorder (!%p611_p10), %v405_v31, 1  ;;  %vm423_vm7 = vcmp.eq.s32.totalorder (!%p611_p10), %v405_v31, 2  ;;  %vm432_vm8 = vcmp.eq.s32.totalorder (!%p611_p10), %v405_v31, 3 }
 0x1d7   : > { %v451_v28 = vld [vmem:[#allocation7] sm:$0xff] (!%p611_p10)  ;;  %v442_v29 = vld [vmem:[#allocation6] sm:$0xff] (!%p611_p10)  ;;  %vm441_vm9 = vcmp.eq.s32.totalorder (!%p611_p10), %v405_v31, 4  ;;  %vm450_vm10 = vcmp.eq.s32.totalorder (!%p611_p10), %v405_v31, 5 }
 0x1d8   : > { %436 = vperm.xlu1 (!%p611_p10), %718, %v433_v26   ;;  %418 = vperm.xlu0 (!%p611_p10), %717, %v415_v27  }
 0x1dc   : > { %454 = vperm.xlu1 %718, %v451_v28   ;;  %445 = vperm.xlu0 %717, %v442_v29  }
 0x253   : > { %v428_v32 = vpop.permute.xlu1 %427  ;;  %v411_v33 = vpop.permute.xlu0 %410 }
 0x254   : > { %v413_v36 = vsel %vm406_vm5, %v411_v33, 0.0  ;;  %v430_v39 = vsel %vm423_vm7, %v428_v32, 0.0 }
 0x257   : > { %v437_v34 = vpop.permute.xlu1 %436  ;;  %v419_v35 = vpop.permute.xlu0 %418 }
 0x258   : > { %v421_v37 = vsel %vm414_vm6, %v419_v35, 0.0  ;;  %v439_v42 = vsel %vm432_vm8, %v437_v34, 0.0 }
 0x259   : > { %v422_v38 = vadd.f32 %v421_v37, %v413_v36 }
 0x25b   : > { %v431_v40 = vadd.f32 %v430_v39, %v422_v38  ;;  %v446_v41 = vpop.permute.xlu0 %445  ;;  %v455_v43 = vpop.permute.xlu1 %454 }
 0x25c   : > { %v448_v45 = vsel %vm441_vm9, %v446_v41, 0.0  ;;  %v457_v47 = vsel %vm450_vm10, %v455_v43, 0.0 }
 0x25d   : > { %v440_v44 = vadd.f32 %v439_v42, %v431_v40 }
 0x25f   : > { %v449_v46 = vadd.f32 %v448_v45, %v440_v44 }
 0x261   : > { %v458_v48 = vadd.f32 %v457_v47, %v449_v46 }
 0x263   : > { %459 = vst [vmem:[%s245_s18] sm:$0xff] %v458_v48 }
 0x264 PF: > { %s613_s15 = sshll.u32 %s889_s16, 7  ;;  %s474_s28 = sshll.u32 %s245_s18, 4  ;;  %s475_s28 = int_to_ptr.vmem [resolvable:$true] %s474_s28 }
 0x265   : > { %s1168_s29 = scalar_lea.hbm %s1230_s2, %s613_s15  ;;  %s461_s27 = scalar_lea.sflag [#allocation10], %s243_s20 }
 0x266   : > { %s775_s30 = scalar_lea.vmem %s475_s28, 128  ;;  %p1249_p11 = scmp.ne.s32.totalorder %s1245_s8, 0 }
 0x267   : > { %p776_p12 = scmp.ne.s32.totalorder %s475_s28, %s775_s30  ;;  %s907_s21 = smov [#allocation13]  }
 0x268   : > { %s779_s4 = sshll.u32 %s907_s21, 4  ;;  %s780_s4 = int_to_ptr.vmem [resolvable:$false] %s779_s4 }
 0x269   : > { %p777_p3 = pnand %p776_p12, %p1249_p11  ;;  %s781_s6 = scalar_lea.vmem %s780_s4, 256 }
 0x26a   : > { %p782_p2 = scmp.lt.s32.totalorder %s475_s28, %s780_s4  ;;  %p783_p0 = scmp.lt.s32.totalorder %s781_s6, %s775_s30 }
 0x26b   : > { %p778_p9 = pneg %p777_p3 }
 0x26c   : > { %p784_p7 = por %p783_p0, %p782_p2 }
 0x26e   : > { %p785_p13 = pnand %p784_p7, %p778_p9 }
 0x270   : > { %788 = shalt.err (!%p785_p13)
}
 0x271   : > { %s789_s16 = scalar_lea.hbm %s1168_s29, 128  ;;  %s793_s20 = scalar_lea.hbm %s1230_s2, 256 }
 0x272   : > { %p790_p1 = scmp.ne.s32.totalorder %s1168_s29, %s789_s16  ;;  %p794_p6 = scmp.lt.u32.totalorder %s1168_s29, %s1230_s2 }
 0x273   : > { %p795_p8 = scmp.lt.u32.totalorder %s793_s20, %s789_s16  ;;  %p797_p12 = scmp.lt.u32.totalorder %s789_s16, %s1168_s29 }
 0x274   : > { %p791_p4 = pnand %p790_p1, %p1249_p11 }
 0x275   : > { %p796_p10 = por %p795_p8, %p794_p6 }
 0x276   : > { %p792_p5 = pneg %p791_p4 }
 0x277   : > { %p798_p3 = por %p797_p12, %p796_p10 }
 0x279   : > { %p799_p9 = pnand %p798_p3, %p792_p5 }
 0x27b   : > { %802 = shalt.err (!%p799_p9)
}
 0x27c   : > { %620 = dma.vmem_to_hbm [thread:$0]  (%p1249_p11), %s475_s28, 128, %s1168_s29, %s461_s27  }
 0x27d PF: > { %p626_p2 = scmp.ge.s32.totalorder %s901_s19, 2  ;;  %s486_s25 = sand.u32 1, %s861_s9  }
 0x27e   : > { %p1250_p0 = scmp.ne.s32.totalorder %s1246_s12, 0  ;;  %s487_s18 = scalar_lea.sflag [#allocation10], %s486_s25 }
 0x280   : > { %p623_p7 = pnand %p626_p2, %p1250_p0 }
 0x282   : > { %856 = dma.done.wait (!%p623_p7), %s487_s18, 128  }
 0x283   : > { %858 = vsyncadd (!%p623_p7), %s487_s18, 4294967168  ;;  %s21_s19 = sadd.s32 1, %s901_s19   ;;  %s1251_s8 = sld [smem:[#allocation21_spill]] }
 0x284   : > { %p18_p13 = scmp.ge.s32.totalorder %s21_s19, 6   ;;  %s1252_s15 = sld [smem:[#allocation17_spill]] }
 0x285   : > { %s1253_s16 = sld [smem:[#allocation18_spill]]  ;;  %s1254_s17 = sld [smem:[#allocation19_spill]] }
 0x286   : > { %s1255_s18 = sld [smem:[#allocation20_spill]]  ;;  %s1256_s9 = smov %s865_s10 }
 0x287   : > { %s1257_s10 = smov %s869_s11  ;;  %s1258_s11 = smov %s1013_s5 }
 0x288   : > { %s1259_s12 = smov %s877_s13  ;;  %s1260_s13 = smov %s881_s14 }
 0x289   : > { %s1261_s14 = smov %s1251_s8  ;;  %20 = sbr.rel (!%p18_p13) target bundleno = 11 (0xb), region = 102 }
 0x290   :  { %492 = vsyncpa [#allocation9], 1 }
 0x291   :  { %494 = vsyncpa [#allocation9 + $0x1], 1 }
 0x292   :  { %495 = vsyncpa [#allocation12], 1 }
 0x293   :  { %497 = vsyncpa [#allocation12 + $0x1], 1 }
 0x294   :  { %498 = vsyncpa [#allocation10], 1 }
 0x295   :  { %500 = vsyncpa [#allocation10 + $0x1], 1 }

</bundles_post_ra>
